<compile_context>
chip_gen: v7x
topology: tpu7x:2x2x1
jax: 0.10.0
libtpu: 0.0.40
codegen_flags: <defaults>
</compile_context>

<pallas_src>
import functools

import numpy as np
import jax
import jax.numpy as jnp
from jax.experimental import pallas as pl
from jax.experimental.pallas import tpu as pltpu


# ----------------------------- Pallas kernel --------------------------------
def _isometric_block_kernel(*refs, K, dil, pad, L, Bt, has_ds):
    """One grid step = `Bt` batch elements, all folded into one matmul N dim.

    x_ref  : (Bt, C_in, L)      unpadded f32 input (cast to bf16 in-kernel)
    w1_ref : (C_out, K*C_in)    im2col-fused conv1 weight, bf16
    b1_ref : (C_out, 1)         f32
    w2_ref : (C_out, K*C_out)   im2col-fused conv2 weight, bf16
    b2_ref : (C_out, 1)         f32
    wd_ref : (C_out, C_in)      1x1 downsample weight, bf16   (only if has_ds)
    bd_ref : (C_out, 1)         f32                            (only if has_ds)
    o_ref  : (Bt, C_out, L)     out_dtype
    """
    if has_ds:
        (x_ref, w1_ref, b1_ref, w2_ref, b2_ref, wd_ref, bd_ref, o_ref) = refs
    else:
        (x_ref, w1_ref, b1_ref, w2_ref, b2_ref, o_ref) = refs

    def causal_shift(a, s):
        # columns [0, s) <- 0 ; columns [s, L) <- a[:, :L-s].
        # Pure lane concatenation: this IS the causal left zero-padding (the
        # right padding is entirely chomped away, so it never needs to exist).
        if s == 0:
            return a
        if s >= L:  # dilation*(K-1) >= L: this tap only ever sees padding
            return jnp.zeros_like(a)
        return jnp.concatenate(
            [jnp.zeros((a.shape[0], s), a.dtype), a[:, :L - s]], axis=1)

    def im2col(per_batch):
        # per_batch: list of Bt (C, L) tiles -> (K*C, Bt*L) stacked operand,
        # tap-major along the contraction axis, batch-major along lanes.
        rows = []
        for t in range(K):
            s = pad - t * dil
            rows.append(
                jnp.concatenate([causal_shift(a, s) for a in per_batch], axis=1))
        return jnp.concatenate(rows, axis=0)

    # Cast in-kernel: HBM only ever reads the f32 input once; MXU sees bf16.
    x_bf = [x_ref[b].astype(jnp.bfloat16) for b in range(Bt)]   # each (C_in, L)

    # ---- conv1 (dilated, causal) + chomp + bias + ReLU ----------------------
    h1 = jnp.dot(w1_ref[...], im2col(x_bf),
                 preferred_element_type=jnp.float32)             # (C_out, Bt*L)
    h1 = jnp.maximum(h1 + b1_ref[...], 0.0)
    # TODO(synk): dropout1/dropout2 are identity (eval mode); training dropout
    # would use pltpu.prng_seed + pltpu.stateful_bernoulli.
    h1b = h1.astype(jnp.bfloat16)

    # ---- conv2 (dilated, causal) + chomp + bias + ReLU ----------------------
    h1_per_b = [h1b[:, b * L:(b + 1) * L] for b in range(Bt)]
    h2 = jnp.dot(w2_ref[...], im2col(h1_per_b),
                 preferred_element_type=jnp.float32)             # (C_out, Bt*L)
    h2 = jnp.maximum(h2 + b2_ref[...], 0.0)

    # ---- residual ------------------------------------------------------------
    if has_ds:
        x_cat = jnp.concatenate(x_bf, axis=1)                    # (C_in, Bt*L)
        res = jnp.dot(wd_ref[...], x_cat,
                      preferred_element_type=jnp.float32) + bd_ref[...]
    else:
        # identity residual: raw f32 input, no matmul, no bf16 round trip.
        res = jnp.concatenate([x_ref[b] for b in range(Bt)], axis=1)

    out = jnp.maximum(h2 + res, 0.0)                             # (C_out, Bt*L)
    # Per-batch static-slice stores; lane-dense (unmasked vst) whenever L is a
    # multiple of 128, with no wrapper-side layout-fixup pass over the output.
    for b in range(Bt):
        o_ref[b] = out[:, b * L:(b + 1) * L].astype(o_ref.dtype)


# ------------------------------- wrapper -------------------------------------
def isometric_conv1d_block(x, w1, b1, w2, b2, wd=None, bd=None, *,
                           kernel_size, stride, dilation, padding, chomp_size,
                           batch_block=1, out_dtype=jnp.float32):
    """x: (B, C_in, L).  w1/w2 are the *effective* (weight-normed) conv
    weights in PyTorch (O, I, K) layout; wd is the optional 1x1 downsample."""
    assert stride == 1, "isometric block requires stride == 1"
    B, C_in, L = x.shape
    C_out = w1.shape[0]
    K = kernel_size
    assert padding == dilation * (K - 1), "expect padding == dilation*(K-1)"
    assert chomp_size == padding, "expect chomp_size == padding (isometric)"
    assert B % batch_block == 0, "batch must be divisible by batch_block"
    Bt = batch_block
    has_ds = wd is not None
    if not has_ds:
        assert C_in == C_out, "identity residual requires n_inputs == n_outputs"

    # im2col-fused weights: (O, I, K) -> (O, K, I) -> (O, K*I); bf16 operands.
    w1f = jnp.transpose(w1, (0, 2, 1)).reshape(C_out, K * C_in).astype(jnp.bfloat16)
    w2f = jnp.transpose(w2, (0, 2, 1)).reshape(C_out, K * C_out).astype(jnp.bfloat16)
    b1c = b1.reshape(C_out, 1).astype(jnp.float32)
    b2c = b2.reshape(C_out, 1).astype(jnp.float32)

    operands = [x, w1f, b1c, w2f, b2c]
    in_specs = [
        pl.BlockSpec((Bt, C_in, L), lambda i: (i, 0, 0)),          # x
        pl.BlockSpec((C_out, K * C_in), lambda i: (0, 0)),         # w1 (fused)
        pl.BlockSpec((C_out, 1), lambda i: (0, 0)),                # b1
        pl.BlockSpec((C_out, K * C_out), lambda i: (0, 0)),        # w2 (fused)
        pl.BlockSpec((C_out, 1), lambda i: (0, 0)),                # b2
    ]
    if has_ds:
        wdc = wd.astype(jnp.bfloat16)
        bdc = (jnp.zeros((C_out,), jnp.float32) if bd is None else bd
               ).reshape(C_out, 1).astype(jnp.float32)
        operands += [wdc, bdc]
        in_specs += [pl.BlockSpec((C_out, C_in), lambda i: (0, 0)),  # wd
                     pl.BlockSpec((C_out, 1), lambda i: (0, 0))]     # bd

    kern = functools.partial(_isometric_block_kernel, K=K, dil=dilation,
                             pad=padding, L=L, Bt=Bt, has_ds=has_ds)

    out_itemsize = jnp.dtype(out_dtype).itemsize
    flops = 2 * B * L * C_out * (K * C_in + K * C_out
                                 + (C_in if has_ds else 0))
    bytes_accessed = int(
        B * C_in * L * 4 + B * C_out * L * out_itemsize
        + (w1f.size + w2f.size) * 2 + (b1c.size + b2c.size) * 4
        + ((wdc.size * 2 + bdc.size * 4) if has_ds else 0))

    # Per-step VMEM budget: double-buffered grid-varying blocks + resident
    # weights + live intermediates (im2col stacks, activations) + headroom,
    # capped at v7x's 64 MiB physical VMEM.
    x_blk = Bt * C_in * L * 4
    o_blk = Bt * C_out * L * out_itemsize
    w_blk = ((w1f.size + w2f.size + (wdc.size if has_ds else 0)) * 2
             + (b1c.size + b2c.size) * 4 + ((bdc.size * 4) if has_ds else 0))
    interm = (K * C_in + K * C_out + 4 * C_out + C_in) * Bt * L * 4
    vmem_limit = int(min(max(2 * (x_blk + o_blk) + w_blk + interm + (4 << 20),
                             16 << 20), 64 << 20))

    return pl.pallas_call(
        kern,
        out_shape=jax.ShapeDtypeStruct((B, C_out, L), out_dtype),
        grid_spec=pltpu.PrefetchScalarGridSpec(
            num_scalar_prefetch=0,
            grid=(B // Bt,),
            in_specs=in_specs,
            out_specs=pl.BlockSpec((Bt, C_out, L), lambda i: (i, 0, 0)),
        ),
        compiler_params=pltpu.CompilerParams(
            dimension_semantics=("parallel",),   # shards batch blocks over TCs
            vmem_limit_bytes=vmem_limit),
        cost_estimate=pl.CostEstimate(flops=flops, transcendentals=0,
                                      bytes_accessed=bytes_accessed),
    )(*operands)


# --------------------------- parameter setup ---------------------------------
def weight_norm_effective(v, g):
    """PyTorch weight_norm (dim=0): w = g * v / ||v||, norm over (in, k)."""
    norm = jnp.sqrt(jnp.sum(v * v, axis=(1, 2), keepdims=True))
    return g[:, None, None] * v / norm


# ------------------------- pure-JAX reference --------------------------------
def _torch_conv1d(x, w, b, stride, padding, dilation):
    out = jax.lax.conv_general_dilated(
        x, w, window_strides=(stride,), padding=[(padding, padding)],
        rhs_dilation=(dilation,), dimension_numbers=('NCH', 'OIH', 'NCH'),
        precision=jax.lax.Precision.HIGHEST,
        preferred_element_type=jnp.float32)
    return out + b[None, :, None]


def ref_forward(x, w1, b1, w2, b2, wd, bd, *, kernel_size, stride, dilation,
                padding, chomp_size):
    # Mirrors the kernel's bf16-operand / f32-accumulate arithmetic so the
    # comparison tolerance can stay tight.
    rb = lambda a: a.astype(jnp.bfloat16).astype(jnp.float32)
    xb, w1b, w2b = rb(x), rb(w1), rb(w2)
    h = _torch_conv1d(xb, w1b, b1, stride, padding, dilation)[:, :, :-chomp_size]
    h = rb(jnp.maximum(h, 0.0))
    h = _torch_conv1d(h, w2b, b2, stride, padding, dilation)[:, :, :-chomp_size]
    h = jnp.maximum(h, 0.0)
    if wd is None:
        res = x
    else:
        res = _torch_conv1d(xb, rb(wd)[:, :, None], bd, 1, 0, 1)
    return jnp.maximum(h + res, 0.0)


# --------------------------------- main ---------------------------------------
if __name__ == "__main__":
    key = jax.random.PRNGKey(0)

    # ---- test 1: n_inputs != n_outputs (downsample conv present) ------------
    B, C_in, C_out, L = 4, 4, 8, 16
    K, stride, dilation = 3, 1, 2
    padding = (K - 1) * dilation          # = 4
    chomp_size = padding                  # = 4  (causal / isometric)

    ks = jax.random.split(key, 8)
    x = jax.random.normal(ks[0], (B, C_in, L), dtype=jnp.float32)
    v1 = 0.01 * jax.random.normal(ks[1], (C_out, C_in, K), dtype=jnp.float32)
    g1 = jax.random.uniform(ks[2], (C_out,), minval=0.5, maxval=1.5)
    w1 = weight_norm_effective(v1, g1)
    b1 = 0.1 * jax.random.normal(ks[3], (C_out,), dtype=jnp.float32)
    v2 = 0.01 * jax.random.normal(ks[4], (C_out, C_out, K), dtype=jnp.float32)
    g2 = jax.random.uniform(ks[5], (C_out,), minval=0.5, maxval=1.5)
    w2 = weight_norm_effective(v2, g2)
    b2 = 0.1 * jax.random.normal(ks[6], (C_out,), dtype=jnp.float32)
    wd = 0.01 * jax.random.normal(ks[7], (C_out, C_in), dtype=jnp.float32)
    bd = jnp.zeros((C_out,), dtype=jnp.float32)

    hp = dict(kernel_size=K, stride=stride, dilation=dilation,
              padding=padding, chomp_size=chomp_size)
    y = isometric_conv1d_block(x, w1, b1, w2, b2, wd, bd,
                               batch_block=2, **hp)
    y = jax.block_until_ready(y)
    y_ref = ref_forward(x, w1, b1, w2, b2, wd, bd, **hp)
    np.testing.assert_allclose(np.asarray(y), np.asarray(y_ref),
                               rtol=1e-4, atol=1e-4)

    # ---- test 2: n_inputs == n_outputs (identity residual, no 1x1 matmul) ---
    B2, C2, L2 = 2, 8, 16
    K2, dil2 = 2, 1
    pad2 = (K2 - 1) * dil2
    ks2 = jax.random.split(jax.random.PRNGKey(1), 7)
    x2 = jax.random.normal(ks2[0], (B2, C2, L2), dtype=jnp.float32)
    w1b_ = weight_norm_effective(
        0.01 * jax.random.normal(ks2[1], (C2, C2, K2), dtype=jnp.float32),
        jax.random.uniform(ks2[2], (C2,), minval=0.5, maxval=1.5))
    b1b_ = 0.1 * jax.random.normal(ks2[3], (C2,), dtype=jnp.float32)
    w2b_ = weight_norm_effective(
        0.01 * jax.random.normal(ks2[4], (C2, C2, K2), dtype=jnp.float32),
        jax.random.uniform(ks2[5], (C2,), minval=0.5, maxval=1.5))
    b2b_ = 0.1 * jax.random.normal(ks2[6], (C2,), dtype=jnp.float32)

    hp2 = dict(kernel_size=K2, stride=1, dilation=dil2,
               padding=pad2, chomp_size=pad2)
    y2 = isometric_conv1d_block(x2, w1b_, b1b_, w2b_, b2b_, None, None,
                                batch_block=1, **hp2)
    y2 = jax.block_until_ready(y2)
    y2_ref = ref_forward(x2, w1b_, b1b_, w2b_, b2b_, None, None, **hp2)
    np.testing.assert_allclose(np.asarray(y2), np.asarray(y2_ref),
                               rtol=1e-4, atol=1e-4)

    print("KERNEL_OK")
</pallas_src>

<mosaic_0001>
module attributes {stable_mosaic.version = 11 : i64} {
  func.func @_isometric_block_kernel(%arg0: i32, %arg1: memref<2x4x16xf32, #tpu.memory_space<vmem>>, %arg2: memref<8x12xbf16, #tpu.memory_space<vmem>>, %arg3: memref<8x1xf32, #tpu.memory_space<vmem>>, %arg4: memref<8x24xbf16, #tpu.memory_space<vmem>>, %arg5: memref<8x1xf32, #tpu.memory_space<vmem>>, %arg6: memref<8x4xbf16, #tpu.memory_space<vmem>>, %arg7: memref<8x1xf32, #tpu.memory_space<vmem>>, %arg8: memref<2x8x16xf32, #tpu.memory_space<vmem>>) attributes {dimension_semantics = [#tpu.dimension_semantics<parallel>], iteration_bounds = array<i64: 2>, scalar_prefetch = 0 : i64, scratch_operands = 0 : i64, tpu.core_type = #tpu.core_type<tc>, window_params = [{transform_indices = @transform_0, window_bounds = array<i64: 2, 4, 16>}, {pipeline_mode = #tpu.pipeline_mode<synchronous>, transform_indices = @transform_1, window_bounds = array<i64: 8, 12>}, {pipeline_mode = #tpu.pipeline_mode<synchronous>, transform_indices = @transform_2, window_bounds = array<i64: 8, 1>}, {pipeline_mode = #tpu.pipeline_mode<synchronous>, transform_indices = @transform_3, window_bounds = array<i64: 8, 24>}, {pipeline_mode = #tpu.pipeline_mode<synchronous>, transform_indices = @transform_4, window_bounds = array<i64: 8, 1>}, {pipeline_mode = #tpu.pipeline_mode<synchronous>, transform_indices = @transform_5, window_bounds = array<i64: 8, 4>}, {pipeline_mode = #tpu.pipeline_mode<synchronous>, transform_indices = @transform_6, window_bounds = array<i64: 8, 1>}, {transform_indices = @transform_7, window_bounds = array<i64: 2, 8, 16>}]} {
    %c0 = arith.constant 0 : index
    %c0_0 = arith.constant 0 : index
    %c0_1 = arith.constant 0 : index
    %0 = vector.load %arg1[%c0, %c0_0, %c0_1] : memref<2x4x16xf32, #tpu.memory_space<vmem>>, vector<1x4x16xf32>
    %1 = vector.shape_cast %0 : vector<1x4x16xf32> to vector<4x16xf32>
    %2 = arith.truncf %1 : vector<4x16xf32> to vector<4x16xbf16>
    %c1 = arith.constant 1 : index
    %c0_2 = arith.constant 0 : index
    %c0_3 = arith.constant 0 : index
    %3 = vector.load %arg1[%c1, %c0_2, %c0_3] : memref<2x4x16xf32, #tpu.memory_space<vmem>>, vector<1x4x16xf32>
    %4 = vector.shape_cast %3 : vector<1x4x16xf32> to vector<4x16xf32>
    %5 = arith.truncf %4 : vector<4x16xf32> to vector<4x16xbf16>
    %c0_4 = arith.constant 0 : index
    %c0_5 = arith.constant 0 : index
    %6 = vector.load %arg2[%c0_4, %c0_5] : memref<8x12xbf16, #tpu.memory_space<vmem>>, vector<8x12xbf16>
    %cst = arith.constant 0.000000e+00 : bf16
    %7 = vector.broadcast %cst : bf16 to vector<4x4xbf16>
    %8 = vector.extract_strided_slice %2 {offsets = [0, 0], sizes = [4, 12], strides = [1, 1]} : vector<4x16xbf16> to vector<4x12xbf16>
    %9 = tpu.concatenate %7, %8 in 1 : vector<4x4xbf16>, vector<4x12xbf16> -> vector<4x16xbf16>
    %cst_6 = arith.constant 0.000000e+00 : bf16
    %10 = vector.broadcast %cst_6 : bf16 to vector<4x4xbf16>
    %11 = vector.extract_strided_slice %5 {offsets = [0, 0], sizes = [4, 12], strides = [1, 1]} : vector<4x16xbf16> to vector<4x12xbf16>
    %12 = tpu.concatenate %10, %11 in 1 : vector<4x4xbf16>, vector<4x12xbf16> -> vector<4x16xbf16>
    %13 = tpu.concatenate %9, %12 in 1 : vector<4x16xbf16>, vector<4x16xbf16> -> vector<4x32xbf16>
    %cst_7 = arith.constant 0.000000e+00 : bf16
    %14 = vector.broadcast %cst_7 : bf16 to vector<4x2xbf16>
    %15 = vector.extract_strided_slice %2 {offsets = [0, 0], sizes = [4, 14], strides = [1, 1]} : vector<4x16xbf16> to vector<4x14xbf16>
    %16 = tpu.concatenate %14, %15 in 1 : vector<4x2xbf16>, vector<4x14xbf16> -> vector<4x16xbf16>
    %cst_8 = arith.constant 0.000000e+00 : bf16
    %17 = vector.broadcast %cst_8 : bf16 to vector<4x2xbf16>
    %18 = vector.extract_strided_slice %5 {offsets = [0, 0], sizes = [4, 14], strides = [1, 1]} : vector<4x16xbf16> to vector<4x14xbf16>
    %19 = tpu.concatenate %17, %18 in 1 : vector<4x2xbf16>, vector<4x14xbf16> -> vector<4x16xbf16>
    %20 = tpu.concatenate %16, %19 in 1 : vector<4x16xbf16>, vector<4x16xbf16> -> vector<4x32xbf16>
    %21 = tpu.concatenate %2, %5 in 1 : vector<4x16xbf16>, vector<4x16xbf16> -> vector<4x32xbf16>
    %22 = tpu.concatenate %13, %20, %21 in 0 : vector<4x32xbf16>, vector<4x32xbf16>, vector<4x32xbf16> -> vector<12x32xbf16>
    %cst_9 = arith.constant dense<0.000000e+00> : vector<8x32xf32>
    %23 = tpu.matmul %6, %22, %cst_9 {dimension_numbers = #tpu.dot_dimension_numbers<[1], [0], [0], [1], [0, 0, 1, 1], [], []>} : vector<8x12xbf16>, vector<12x32xbf16>, vector<8x32xf32> -> vector<8x32xf32>
    %c0_10 = arith.constant 0 : index
    %c0_11 = arith.constant 0 : index
    %24 = vector.load %arg3[%c0_10, %c0_11] : memref<8x1xf32, #tpu.memory_space<vmem>>, vector<8x1xf32>
    %25 = vector.broadcast %24 : vector<8x1xf32> to vector<8x32xf32>
    %26 = arith.addf %23, %25 : vector<8x32xf32>
    %cst_12 = arith.constant 0.000000e+00 : f32
    %27 = vector.broadcast %cst_12 : f32 to vector<8x32xf32>
    %28 = arith.maximumf %26, %27 : vector<8x32xf32>
    %29 = arith.truncf %28 : vector<8x32xf32> to vector<8x32xbf16>
    %30 = vector.extract_strided_slice %29 {offsets = [0, 0], sizes = [8, 16], strides = [1, 1]} : vector<8x32xbf16> to vector<8x16xbf16>
    %31 = vector.extract_strided_slice %29 {offsets = [0, 16], sizes = [8, 16], strides = [1, 1]} : vector<8x32xbf16> to vector<8x16xbf16>
    %c0_13 = arith.constant 0 : index
    %c0_14 = arith.constant 0 : index
    %32 = vector.load %arg4[%c0_13, %c0_14] : memref<8x24xbf16, #tpu.memory_space<vmem>>, vector<8x24xbf16>
    %cst_15 = arith.constant 0.000000e+00 : bf16
    %33 = vector.broadcast %cst_15 : bf16 to vector<8x4xbf16>
    %34 = vector.extract_strided_slice %30 {offsets = [0, 0], sizes = [8, 12], strides = [1, 1]} : vector<8x16xbf16> to vector<8x12xbf16>
    %35 = tpu.concatenate %33, %34 in 1 : vector<8x4xbf16>, vector<8x12xbf16> -> vector<8x16xbf16>
    %cst_16 = arith.constant 0.000000e+00 : bf16
    %36 = vector.broadcast %cst_16 : bf16 to vector<8x4xbf16>
    %37 = vector.extract_strided_slice %31 {offsets = [0, 0], sizes = [8, 12], strides = [1, 1]} : vector<8x16xbf16> to vector<8x12xbf16>
    %38 = tpu.concatenate %36, %37 in 1 : vector<8x4xbf16>, vector<8x12xbf16> -> vector<8x16xbf16>
    %39 = tpu.concatenate %35, %38 in 1 : vector<8x16xbf16>, vector<8x16xbf16> -> vector<8x32xbf16>
    %cst_17 = arith.constant 0.000000e+00 : bf16
    %40 = vector.broadcast %cst_17 : bf16 to vector<8x2xbf16>
    %41 = vector.extract_strided_slice %30 {offsets = [0, 0], sizes = [8, 14], strides = [1, 1]} : vector<8x16xbf16> to vector<8x14xbf16>
    %42 = tpu.concatenate %40, %41 in 1 : vector<8x2xbf16>, vector<8x14xbf16> -> vector<8x16xbf16>
    %cst_18 = arith.constant 0.000000e+00 : bf16
    %43 = vector.broadcast %cst_18 : bf16 to vector<8x2xbf16>
    %44 = vector.extract_strided_slice %31 {offsets = [0, 0], sizes = [8, 14], strides = [1, 1]} : vector<8x16xbf16> to vector<8x14xbf16>
    %45 = tpu.concatenate %43, %44 in 1 : vector<8x2xbf16>, vector<8x14xbf16> -> vector<8x16xbf16>
    %46 = tpu.concatenate %42, %45 in 1 : vector<8x16xbf16>, vector<8x16xbf16> -> vector<8x32xbf16>
    %47 = tpu.concatenate %30, %31 in 1 : vector<8x16xbf16>, vector<8x16xbf16> -> vector<8x32xbf16>
    %48 = tpu.concatenate %39, %46, %47 in 0 : vector<8x32xbf16>, vector<8x32xbf16>, vector<8x32xbf16> -> vector<24x32xbf16>
    %cst_19 = arith.constant dense<0.000000e+00> : vector<8x32xf32>
    %49 = tpu.matmul %32, %48, %cst_19 {dimension_numbers = #tpu.dot_dimension_numbers<[1], [0], [0], [1], [0, 0, 1, 1], [], []>} : vector<8x24xbf16>, vector<24x32xbf16>, vector<8x32xf32> -> vector<8x32xf32>
    %c0_20 = arith.constant 0 : index
    %c0_21 = arith.constant 0 : index
    %50 = vector.load %arg5[%c0_20, %c0_21] : memref<8x1xf32, #tpu.memory_space<vmem>>, vector<8x1xf32>
    %51 = vector.broadcast %50 : vector<8x1xf32> to vector<8x32xf32>
    %52 = arith.addf %49, %51 : vector<8x32xf32>
    %cst_22 = arith.constant 0.000000e+00 : f32
    %53 = vector.broadcast %cst_22 : f32 to vector<8x32xf32>
    %54 = arith.maximumf %52, %53 : vector<8x32xf32>
    %55 = tpu.concatenate %2, %5 in 1 : vector<4x16xbf16>, vector<4x16xbf16> -> vector<4x32xbf16>
    %c0_23 = arith.constant 0 : index
    %c0_24 = arith.constant 0 : index
    %56 = vector.load %arg6[%c0_23, %c0_24] : memref<8x4xbf16, #tpu.memory_space<vmem>>, vector<8x4xbf16>
    %cst_25 = arith.constant dense<0.000000e+00> : vector<8x32xf32>
    %57 = tpu.matmul %56, %55, %cst_25 {dimension_numbers = #tpu.dot_dimension_numbers<[1], [0], [0], [1], [0, 0, 1, 1], [], []>} : vector<8x4xbf16>, vector<4x32xbf16>, vector<8x32xf32> -> vector<8x32xf32>
    %c0_26 = arith.constant 0 : index
    %c0_27 = arith.constant 0 : index
    %58 = vector.load %arg7[%c0_26, %c0_27] : memref<8x1xf32, #tpu.memory_space<vmem>>, vector<8x1xf32>
    %59 = vector.broadcast %58 : vector<8x1xf32> to vector<8x32xf32>
    %60 = arith.addf %57, %59 : vector<8x32xf32>
    %61 = arith.addf %54, %60 : vector<8x32xf32>
    %cst_28 = arith.constant 0.000000e+00 : f32
    %62 = vector.broadcast %cst_28 : f32 to vector<8x32xf32>
    %63 = arith.maximumf %61, %62 : vector<8x32xf32>
    %64 = vector.extract_strided_slice %63 {offsets = [0, 0], sizes = [8, 16], strides = [1, 1]} : vector<8x32xf32> to vector<8x16xf32>
    %c0_29 = arith.constant 0 : index
    %c0_30 = arith.constant 0 : index
    %c0_31 = arith.constant 0 : index
    %65 = vector.load %arg8[%c0_29, %c0_30, %c0_31] : memref<2x8x16xf32, #tpu.memory_space<vmem>>, vector<1x8x16xf32>
    %66 = vector.shape_cast %65 : vector<1x8x16xf32> to vector<8x16xf32>
    %67 = vector.shape_cast %64 : vector<8x16xf32> to vector<1x8x16xf32>
    tpu.vector_store %arg8[%c0_29, %c0_30, %c0_31], %67 {strides = array<i32>} : memref<2x8x16xf32, #tpu.memory_space<vmem>>, vector<1x8x16xf32>,
    %68 = vector.extract_strided_slice %63 {offsets = [0, 16], sizes = [8, 16], strides = [1, 1]} : vector<8x32xf32> to vector<8x16xf32>
    %c1_32 = arith.constant 1 : index
    %c0_33 = arith.constant 0 : index
    %c0_34 = arith.constant 0 : index
    %69 = vector.load %arg8[%c1_32, %c0_33, %c0_34] : memref<2x8x16xf32, #tpu.memory_space<vmem>>, vector<1x8x16xf32>
    %70 = vector.shape_cast %69 : vector<1x8x16xf32> to vector<8x16xf32>
    %71 = vector.shape_cast %68 : vector<8x16xf32> to vector<1x8x16xf32>
    tpu.vector_store %arg8[%c1_32, %c0_33, %c0_34], %71 {strides = array<i32>} : memref<2x8x16xf32, #tpu.memory_space<vmem>>, vector<1x8x16xf32>,
    return
  }
  func.func @transform_0(%arg0: i32) -> (i32, i32, i32) {
    %c0_i32 = arith.constant 0 : i32
    %c0_i32_0 = arith.constant 0 : i32
    %c0_i32_1 = arith.constant 0 : i32
    return %arg0, %c0_i32, %c0_i32_0 : i32, i32, i32
  }
  func.func @transform_1(%arg0: i32) -> (i32, i32) {
    %c0_i32 = arith.constant 0 : i32
    %c0_i32_0 = arith.constant 0 : i32
    %c0_i32_1 = arith.constant 0 : i32
    return %c0_i32, %c0_i32_0 : i32, i32
  }
  func.func @transform_2(%arg0: i32) -> (i32, i32) {
    %c0_i32 = arith.constant 0 : i32
    %c0_i32_0 = arith.constant 0 : i32
    %c0_i32_1 = arith.constant 0 : i32
    return %c0_i32, %c0_i32_0 : i32, i32
  }
  func.func @transform_3(%arg0: i32) -> (i32, i32) {
    %c0_i32 = arith.constant 0 : i32
    %c0_i32_0 = arith.constant 0 : i32
    %c0_i32_1 = arith.constant 0 : i32
    return %c0_i32, %c0_i32_0 : i32, i32
  }
  func.func @transform_4(%arg0: i32) -> (i32, i32) {
    %c0_i32 = arith.constant 0 : i32
    %c0_i32_0 = arith.constant 0 : i32
    %c0_i32_1 = arith.constant 0 : i32
    return %c0_i32, %c0_i32_0 : i32, i32
  }
  func.func @transform_5(%arg0: i32) -> (i32, i32) {
    %c0_i32 = arith.constant 0 : i32
    %c0_i32_0 = arith.constant 0 : i32
    %c0_i32_1 = arith.constant 0 : i32
    return %c0_i32, %c0_i32_0 : i32, i32
  }
  func.func @transform_6(%arg0: i32) -> (i32, i32) {
    %c0_i32 = arith.constant 0 : i32
    %c0_i32_0 = arith.constant 0 : i32
    %c0_i32_1 = arith.constant 0 : i32
    return %c0_i32, %c0_i32_0 : i32, i32
  }
  func.func @transform_7(%arg0: i32) -> (i32, i32, i32) {
    %c0_i32 = arith.constant 0 : i32
    %c0_i32_0 = arith.constant 0 : i32
    %c0_i32_1 = arith.constant 0 : i32
    return %arg0, %c0_i32, %c0_i32_0 : i32, i32, i32
  }
}

</mosaic_0001>

<bundles_post_ra>
// kernel: tpu_custom_call.1
= control target key start
LH: loop header
LB: loop body
LE: loop exit
PB: predicated region body
PF: predicated region fallthrough
CT: control target
= control target key end

     0   :  { %12 = vsyncpa [#allocation3], 0  ;;  %s988_s0 = inlined_call_operand.vmem [shape: f32[4,4,16], index: 0, kind: input, shape index: {}]   ;;  %s989_s1 = inlined_call_operand.vmem [shape: bf16[8,12], index: 1, kind: input, shape index: {}]   ;;  %s990_s2 = inlined_call_operand.vmem [shape: f32[8,1], index: 2, kind: input, shape index: {}]   ;;  %s991_s3 = inlined_call_operand.vmem [shape: bf16[8,24], index: 3, kind: input, shape index: {}]   ;;  %s992_s4 = inlined_call_operand.vmem [shape: f32[8,1], index: 4, kind: input, shape index: {}]   ;;  %s993_s5 = inlined_call_operand.vmem [shape: bf16[8,4], index: 5, kind: input, shape index: {}]   ;;  %s994_s6 = inlined_call_operand.vmem [shape: f32[8,1], index: 6, kind: input, shape index: {}]   ;;  %s995_s7 = inlined_call_operand.hbm [shape: f32[4,8,16], index: 7, kind: output, shape index: {}]  }
   0x1   :  { %14 = vsyncpa [#allocation3 + $0x1], 0  ;;  %s826_s24 = smov 0   ;;  %s828_s25 = smov 0  }
   0x2   :  { %s830_s26 = smov 0   ;;  %s832_s27 = smov 0  }
   0x3 LB: > { %s847_s28 = sadd.s32 4294967295, %s772_s27   ;;  %s613_s29 = sadd.s32 4294967294, %s772_s27   ;;  %s772_s27 = sphi %s832_s27, %s1001_s27   ;;  %s768_s26 = sphi %s830_s26, %s1000_s26   ;;  %s764_s25 = sphi %s828_s25, %s999_s25   ;;  %s760_s24 = sphi %s826_s24, %s998_s24  }
   0x4   : > { %s851_s30 = sadd.s32 1, %s772_s27   ;;  %s179_s8 = sadd.s32 1, %s768_s26 }
   0x5   : > { %s176_s9 = ssub.s32 %s772_s27, %s851_s30  ;;  %p189_p0 = scmp.ne.s32.totalorder %s768_s26, %s764_s25 }
   0x6   : > { %p177_p1 = scmp.eq.s32.totalorder %s176_s9, 0  ;;  %p190_p2 = scmp.eq.s32.totalorder %s847_s28, 1 }
   0x7   : > { %p195_p3 = scmp.ne.s32.totalorder %s764_s25, %s760_s24  ;;  %p196_p4 = scmp.eq.s32.totalorder %s613_s29, 1 }
   0x8   : > { %s862_s10 = scalar_select %p177_p1, %s768_s26, %s179_s8  }
   0x9   : > { %p864_p5 = por %p190_p2, %p189_p0  ;;  %p868_p6 = por %p196_p4, %p195_p3 }
   0xa   : > { %p616_p7 = scmp.ge.s32.totalorder %s772_s27, 1  ;;  %p241_p8 = scmp.lt.s32.totalorder %s772_s27, 3 }
   0xc   : > { %p242_p9 = pnand %p616_p7, %p241_p8 }
   0xd   : > { %s618_s13 = sshll.u32 (!%p242_p9), %s847_s28, 1  ;;  %s774_s18 = smov (!%p242_p9), 2   ;;  %v776_v4 = vmov (!%p242_p9), 0.0   ;;  %vm307_vm0 = vcmask (!%p242_p9), 15360   ;;  %vm777_vm1 = vmmov (!%p242_p9), 0   ;;  %vm290_vm2 = vcmask (!%p242_p9), 31744  }
   0xe   : > { %245 = sbr.rel (%p242_p9) target bundleno = 1082 (0x43a), region = 48  ;;  %p274_p10 = scmp.lt.s32.totalorder (!%p242_p9), %s618_s13, 3  ;;  %638 = vmatprep.subr.bf16.mxu0 (!%p242_p9), %v776_v4  ;;  %644 = vmatprep.subr.bf16.mxu1 (!%p242_p9), %v776_v4  ;;  %v779_v7 = vmov (!%p242_p9), 0   ;;  %v334_v10 = vld [vmem:[%s990_s2] sm:$0xff] (!%p242_p9)  ;;  %vm302_vm3 = vcmask (!%p242_p9), 130048   ;;  %vm328_vm4 = vcmask (!%p242_p9), 1041408  }
   0xf   : > { %s775_s19 = smov (!%p242_p9), 4   ;;  %640 = vmatprep.mubr.msk.bf16.mxu0 (!%p242_p9), %vm777_vm1, %v776_v4  ;;  %648 = vmatprep.mubr.msk.bf16.mxu1 (!%p242_p9), %vm777_vm1, %v776_v4  ;;  %s778_s20 = smov (!%p242_p9), 16   ;;  %vm331_vm5 = vcmask (!%p242_p9), 1043456   ;;  %vm344_vm6 = vcmask (!%p242_p9), 1045504   ;;  %v286_v26 = vld [vmem:[%s989_s1] sm:$0xf] (!%p242_p9) }
  0x10   : > { %708 = vset.pattern.permute.xlu1 (!%p242_p9), %v779_v7  ;;  %709 = vset.pattern.permute.xlu0 (!%p242_p9), %v779_v7  ;;  %vm340_vm7 = vcmask (!%p242_p9), 97280   ;;  %v476_v28 = vld [vmem:[%s993_s5] sm:$0xf] (!%p242_p9)  ;;  %vm429_vm8 = vcmask (!%p242_p9), 195584   ;;  %s270_s21 = sand.u32 (!%p242_p9), 1, %s764_s25   ;;  %s782_s23 = smov (!%p242_p9), 112  }
  0x11   : > { %v477_v45 = vld [vmem:[%s994_s6] sm:$0xff] (!%p242_p9)  ;;  %s617_s22 = sshll.u32 (!%p242_p9), %s270_s21, 4  ;;  %s630_s9 = sshll.u32 (!%p242_p9), %s847_s28, 8 }
  0x12   : > { %v423_v46 = vld [vmem:[%s992_s4] sm:$0xff] (!%p242_p9)  ;;  %s272_s29 = scalar_lea.vmem (!%p242_p9), [#allocation2], %s617_s22  ;;  %s944_s15 = scalar_lea.hbm (!%p242_p9), %s995_s7, %s630_s9 }
  0x13   : > { %v389_v58 = vld [vmem:[%s991_s3] sm:$0xf] (!%p242_p9)  ;;  %s551_s8 = sshll.u32 (!%p242_p9), %s272_s29, 4  ;;  %s947_s16 = scalar_lea.sflag (!%p242_p9), [#allocation3], %s270_s21  ;;  %s939_s8 = int_to_ptr.vmem [resolvable:$true] %s551_s8 }
  0x14   : > { %s783_s28 = smov (!%p242_p9), [#allocation2]  }
  0x15   : > { %s1003_s13 = smov (!%p274_p10, %s618_s13), 3 }
  0x16   : > { %s619_s14 = sshll.u32 %s1003_s13, 2  ;;  %s780_s13 = smov 116  }
  0x17   : > { %s277_s17 = scalar_lea.vmem %s988_s0, %s619_s14  ;;  %s781_s14 = smov 114  }
  0x18   : > { %v620_v0 = vld [vmem:[%s277_s17 + $0x4] sm:$0xf]  ;;  %v281_v1 = vld [vmem:[%s277_s17] sm:$0xf]  ;;  %s710_s17 = scalar_lea.vmem %s939_s8, 256 }
  0x19   : > { %v285_v2 = vpack.c.bf16 %v620_v0, %v620_v0  ;;  %v282_v3 = vpack.c.bf16 %v281_v1, %v281_v1  ;;  %p711_p11 = scmp.ne.s32.totalorder %s939_s8, %s710_s17 }
  0x1b   : > { %310 = vrot.lane.b32.xlu0 %v285_v2, %s774_s18  ;;  %305 = vrot.lane.b32.xlu1 %v282_v3, %s774_s18  ;;  %p712_p12 = pnand %p711_p11, %p864_p5 }
  0x1d   : > { %p713_p13 = pneg %p712_p12 }
  0x1f   : > { %295 = vrot.lane.b32.xlu0 %v285_v2, %s775_s19 }
  0x23   : > { %288 = vrot.lane.b32.xlu0 %v282_v3, %s775_s19 }
  0x8d   : > { %v311_v5 = vpop.permute.xlu0 %310  ;;  %v306_v11 = vpop.permute.xlu1 %305 }
  0x8e   : > { %v313_v6 = vsel %vm307_vm0, 0, %v311_v5  ;;  %v309_v13 = vsel %vm307_vm0, 0, %v306_v11 }
  0x8f   : > { %315 = vrot.lane.b32.xlu1 %v313_v6, %s778_s20 }
  0x91   : > { %v296_v8 = vpop.permute.xlu0 %295 }
  0x92   : > { %v298_v9 = vsel %vm290_vm2, 0, %v296_v8 }
  0x93   : > { %300 = vrot.lane.b32.xlu0 %v298_v9, %s778_s20  ;;  %319 = vrot.lane.b32.xlu1 %v285_v2, %s778_s20 }
  0x95   : > { %v289_v12 = vpop.permute.xlu0 %288 }
  0x96   : > { %v293_v16 = vsel %vm290_vm2, 0, %v289_v12 }
  0x97   : > { %337 = vperm.xlu1 %708, %v334_v10  }
 0x101   : > { %v316_v14 = vpop.permute.xlu1 %315 }
 0x102   : > { %v318_v15 = vsel %vm302_vm3, %v309_v13, %v316_v14 }
 0x103   : > { %v325_v17 = vrot.slane %v318_v15, 6 }
 0x105   : > { %v301_v18 = vpop.permute.xlu0 %300  ;;  %v320_v19 = vpop.permute.xlu1 %319 }
 0x106   : > { %v304_v20 = vsel %vm302_vm3, %v293_v16, %v301_v18  ;;  %v323_v21 = vsel %vm302_vm3, %v282_v3, %v320_v19 }
 0x107   : > { %v327_v22 = vrot.slane %v323_v21, 4  ;;  %v330_v23 = vsel %vm328_vm4, %v304_v20, %v325_v17  ;;  %v486_v27 = vsel %vm328_vm4, %v323_v21, 0 }
 0x109   : > { %v333_v24 = vsel %vm331_vm5, %v330_v23, %v327_v22 }
 0x10a   : > { %v345_v25 = vsel %vm344_vm6, %v333_v24, 0 }
 0x10b   : > { %639 = vmatpush3.bf16.msra.mxu0 %v345_v25 }
 0x10c   : > { %652 = vmatprep.subr.bf16.mxu0 %v776_v4 }
 0x10e   : > { %641 = vmatmul.mubr.msk.bf16.vlgmr.msra.gmra.mrb[0].mxu0 %vm340_vm7, %v286_v26 }
 0x10f   : > { %653 = vmatpush3.bf16.msra.mxu0 %v486_v27  ;;  %654 = vmatprep.mubr.msk.bf16.mxu0 %vm777_vm1, %v776_v4 }
 0x116   : > { %655 = vmatmul.mubr.msk.bf16.vlgmr.msra.gmra.mrb[4].mxu0 %vm290_vm2, %v476_v28  ;;  %v338_v29 = vpop.permute.xlu1 %337 }
 0x1e1   : > { %v381_v30 = vpop.f32.mrb[0].mxu0 }
 0x1e2   : > { %v382_v31 = vadd.f32 %v381_v30, %v338_v29  ;;  %v642_v32 = vpop.f32.mrb[1].mxu0 }
 0x1e3   : > { %v384_v33 = vpop.f32.mrb[2].mxu0 }
 0x1e4   : > { %v387_v34 = vmax.f32 %v382_v31, 0.0  ;;  %v643_v35 = vpop.f32.mrb[3].mxu0 }
 0x1e6   : > { %v388_v36 = vpack.c.bf16 %v387_v34, %v387_v34 }
 0x1e8   : > { %395 = vrot.lane.b32.xlu1 %v388_v36, %s780_s13  ;;  %408 = vrot.lane.b32.xlu0 %v388_v36, %s781_s14  ;;  %v433_v57 = vsel %vm331_vm5, %v388_v36, 0 }
 0x1e9   : > { %v522_v40 = vpop.f32.mrb[4].mxu0 }
 0x1ea   : > { %v656_v41 = vpop.f32.mrb[5].mxu0 }
 0x1eb   : > { %v525_v42 = vpop.f32.mrb[6].mxu0 }
 0x1ec   : > { %404 = vrot.lane.b32.xlu0 %v388_v36, %s774_s18  ;;  %v657_v44 = vpop.f32.mrb[7].mxu0  ;;  %s714_s18 = sshll.u32 %s783_s28, 4  ;;  %s715_s18 = int_to_ptr.vmem [resolvable:$false] %s714_s18 }
 0x1ed   : > { %p717_p0 = scmp.lt.s32.totalorder %s939_s8, %s715_s18 }
 0x1f0   : > { %391 = vrot.lane.b32.xlu0 %v388_v36, %s775_s19  ;;  %s716_s19 = scalar_lea.vmem %s715_s18, 512 }
 0x1f1   : > { %p718_p1 = scmp.lt.s32.totalorder %s716_s19, %s710_s17 }
 0x1f3   : > { %p719_p2 = por %p718_p1, %p717_p0 }
 0x1f4   : > { %426 = vperm.xlu0 %709, %v423_v46  }
 0x1f5   : > { %p720_p3 = pnand %p719_p2, %p713_p13 }
 0x25a   : > { %v409_v37 = vpop.permute.xlu0 %408  ;;  %v396_v39 = vpop.permute.xlu1 %395 }
 0x25b   : > { %v411_v38 = vsel %vm307_vm0, 0, %v409_v37  ;;  %v398_v43 = vsel %vm290_vm2, 0, %v396_v39 }
 0x25c   : > { %413 = vrot.lane.b32.xlu1 %v411_v38, %s778_s20 }
 0x25e   : > { %v405_v47 = vpop.permute.xlu0 %404 }
 0x25f   : > { %v407_v48 = vsel %vm307_vm0, 0, %v405_v47 }
 0x260   : > { %400 = vrot.lane.b32.xlu1 %v398_v43, %s778_s20 }
 0x262   : > { %v392_v50 = vpop.permute.xlu0 %391 }
 0x263   : > { %v394_v52 = vsel %vm290_vm2, 0, %v392_v50 }
 0x264   : > { %480 = vperm.xlu1 %708, %v477_v45  }
 0x273   : > { %v427_v59 = vpop.permute.xlu0 %426 }
 0x2ce   : > { %v414_v49 = vpop.permute.xlu1 %413 }
 0x2cf   : > { %v416_v51 = vsel %vm302_vm3, %v407_v48, %v414_v49 }
 0x2d0   : > { %v419_v53 = vrot.slane %v416_v51, 4 }
 0x2d2   : > { %v401_v54 = vpop.permute.xlu1 %400 }
 0x2d3   : > { %v403_v55 = vsel %vm302_vm3, %v394_v52, %v401_v54 }
 0x2d4   : > { %v421_v56 = vsel %vm331_vm5, %v403_v55, %v419_v53 }
 0x2d5   : > { %645 = vmatpush3.bf16.msra.mxu1 %v421_v56 }
 0x2d6   : > { %646 = vmatprep.subr.bf16.mxu1 %v776_v4 }
 0x2d9   : > { %647 = vmatpush3.bf16.msra.mxu1 %v433_v57 }
 0x2dc   : > { %649 = vmatmul.mubr.msk.bf16.vlgmr.msra.gmra.mrb[0].mxu1 %vm429_vm8, %v389_v58 }
 0x2e3   : > { %v481_v60 = vpop.permute.xlu1 %480 }
 0x2e4   : > { %v523_v1 = vadd.f32 %v522_v40, %v481_v60 }
 0x3af   : > { %v469_v61 = vpop.f32.mrb[0].mxu1 }
 0x3b0   : > { %v470_v62 = vadd.f32 %v469_v61, %v427_v59  ;;  %v650_v63 = vpop.f32.mrb[1].mxu1 }
 0x3b1   : > { %v472_v0 = vpop.f32.mrb[2].mxu1 }
 0x3b2   : > { %v475_v2 = vmax.f32 %v470_v62, 0.0  ;;  %v651_v3 = vpop.f32.mrb[3].mxu1 }
 0x3b4   : > { %v528_v4 = vadd.f32 %v523_v1, %v475_v2 }
 0x3b6   : > { %v529_v5 = vmax.f32 %v528_v4, 0.0 }
 0x3b8   : > { %532 = vrot.lane.b32.xlu1 %v529_v5, %s782_s23  ;;  %530 = vst.msk [vmem:[%s272_s29] sm:$0xff] %vm302_vm3, %v529_v5 }
 0x42a   : > { %v533_v6 = vpop.permute.xlu1 %532 }
 0x42b   : > { %624 = vst.msk [vmem:[%s272_s29 + $0x8] sm:$0xff] %vm302_vm3, %v533_v6 }
 0x42c   : > { %723 = shalt.err (!%p720_p3)
}
 0x42d   : > { %s724_s20 = scalar_lea.hbm %s944_s15, 256  ;;  %s728_s23 = scalar_lea.hbm %s995_s7, 512 }
 0x42e   : > { %p725_p4 = scmp.ne.s32.totalorder %s944_s15, %s724_s20  ;;  %p729_p9 = scmp.lt.u32.totalorder %s944_s15, %s995_s7 }
 0x42f   : > { %p730_p10 = scmp.lt.u32.totalorder %s728_s23, %s724_s20  ;;  %p732_p12 = scmp.lt.u32.totalorder %s724_s20, %s944_s15 }
 0x430   : > { %p726_p7 = pnand %p725_p4, %p864_p5 }
 0x431   : > { %p731_p11 = por %p730_p10, %p729_p9 }
 0x432   : > { %p727_p8 = pneg %p726_p7 }
 0x433   : > { %p733_p13 = por %p732_p12, %p731_p11 }
 0x435   : > { %p734_p0 = pnand %p733_p13, %p727_p8 }
 0x437   : > { %737 = shalt.err (!%p734_p0)
}
 0x438   : > { %s784_s13 = smov 128   ;;  %s785_s14 = smov 8  }
 0x439   : > { %658 = dma.vmem_to_hbm [thread:$0]  (%p864_p5), %s939_s8, 256, %s944_s15, %s947_s16, %s784_s13, %s784_s13, %s785_s14  }
 0x43a PF: > { %p664_p1 = scmp.ge.s32.totalorder %s772_s27, 2  ;;  %s566_s17 = sand.u32 1, %s760_s24  }
 0x43b   : > { %s567_s28 = scalar_lea.sflag [#allocation3], %s566_s17 }
 0x43c   : > { %p661_p2 = pnand %p664_p1, %p868_p6 }
 0x43e   : > { %755 = dma.done.wait (!%p661_p2), %s567_s28, 256  }
 0x43f   : > { %757 = vsyncadd (!%p661_p2), %s567_s28, 4294967040  ;;  %p17_p3 = scmp.ge.s32.totalorder %s851_s30, 4   ;;  %s998_s24 = smov %s764_s25 }
 0x440   : > { %s999_s25 = smov %s768_s26  ;;  %s1000_s26 = smov %s862_s10 }
 0x441   : > { %s1001_s27 = smov %s851_s30  ;;  %19 = sbr.rel (!%p17_p3) target bundleno = 3 (0x3), region = 85 }
 0x448   :  { %572 = vsyncpa [#allocation3], 1 }
 0x449   :  { %574 = vsyncpa [#allocation3 + $0x1], 1 }

</bundles_post_ra>
